<compile_context>
chip_gen: v5e
topology: v5e:2x2
jax: 0.10.0
libtpu: 0.0.40
codegen_flags: <defaults>
</compile_context>

<pallas_src>
import functools

import jax
import jax.numpy as jnp
from jax import lax
from jax.experimental import pallas as pl
from jax.experimental.pallas import tpu as pltpu

ALPHA = 0.5
TAU = 3.0
_NEG = -1e30   # finite "minus infinity" used to pad class lanes in the wrapper


def _distill_kernel(labels_ref, x_ref, wt_ref, bt_ref, cls_ref, kd_ref,
                    res_ref, base_acc, kl_acc,
                    *, n_classes, c_pad, inv_tau, pad):
    j = pl.program_id(1)

    @pl.when(j == 0)
    def _init():
        base_acc[...] = jnp.zeros_like(base_acc)
        kl_acc[...] = jnp.zeros_like(kl_acc)

    tb = cls_ref.shape[0]
    lane = lax.broadcasted_iota(jnp.int32, (tb, c_pad), 1)

    # ---- teacher forward (MXU, bf16 operands, f32 accumulate) -------------
    # TODO(synk): the real teacher is an arbitrary vision model; modeled here
    # as a linear classifier so the whole hot path stays inside the kernel.
    t_logits = jnp.dot(x_ref[...], wt_ref[...],
                       preferred_element_type=jnp.float32) + bt_ref[...]

    # ---- base criterion: CrossEntropy(mean) on student class-token logits -
    # Pad lanes already hold -1e30 (wrapper padding) -> no in-kernel masking.
    logits = cls_ref[...].astype(jnp.float32)
    m = jnp.max(logits, axis=-1, keepdims=True)
    s = logits - m
    log_p = s - jnp.log(jnp.sum(jnp.exp(s), axis=-1, keepdims=True))
    onehot = (lane == labels_ref[...]).astype(jnp.float32)   # labels assumed < C
    base_acc[...] += jnp.sum(onehot * (-log_p), axis=0, keepdims=True)

    # ---- soft distillation: KL(log_softmax(kd/T) || log_softmax(t/T)) -----
    ks = kd_ref[...].astype(jnp.float32) * inv_tau
    ms = jnp.max(ks, axis=-1, keepdims=True)
    ss = ks - ms
    log_ps = ss - jnp.log(jnp.sum(jnp.exp(ss), axis=-1, keepdims=True))

    kt = t_logits * inv_tau
    mt = jnp.max(kt, axis=-1, keepdims=True)
    st = kt - mt
    et = jnp.exp(st)
    denom = jnp.sum(et, axis=-1, keepdims=True)
    pt = et * pl.reciprocal(denom, approx=True)        # EUP; ~2^-12 rel. error
    log_pt = st - jnp.log(denom)
    kl_terms = pt * (log_pt - log_ps)
    if pad:
        # Pad lanes already contribute exactly 0 (pt underflows); keep a single
        # cheap safeguard select rather than five masking passes.
        kl_terms = jnp.where(lane < n_classes, kl_terms, 0.0)
    kl_acc[...] += jnp.sum(kl_terms, axis=0, keepdims=True)

    # ---- emit per-core raw partial sums on the last batch tile ------------
    @pl.when(j == pl.num_programs(1) - 1)
    def _finalize():
        base_sum = jnp.sum(base_acc[...])              # single 128-lane reduce
        kl_sum = jnp.sum(kl_acc[...])
        out_lane = lax.broadcasted_iota(jnp.int32, res_ref.shape, 2)
        res_ref[...] = jnp.where(out_lane == 0, base_sum,
                                 jnp.where(out_lane == 1, kl_sum, 0.0))


def _vmem_limit_bytes():
    """Scoped-VMEM limit per generation: ~100 MiB on 128-MiB parts (v5e/v6e),
    48 MiB on 64-MiB parts (v7x)."""
    cap = 64 * 1024 * 1024
    try:
        cap = int(pltpu.get_tpu_info().vmem_capacity_bytes)
    except Exception:
        pass
    return 48 * 1024 * 1024 if cap <= 64 * 1024 * 1024 else 100 * 1024 * 1024


def _resident_spec(shape):
    """Constant-index resident block, single-buffered (double-buffering a block
    whose index_map never changes is pure VMEM waste)."""
    index_map = lambda p, j: (0,) * len(shape)
    try:
        return pl.BlockSpec(shape, index_map, pipeline_mode=pl.Buffered(1))
    except Exception:
        return pl.BlockSpec(shape, index_map)


def _plan_tiles(batch, d, c_pad, x_bytes, logit_bytes, vmem_limit):
    """Split the batch over (up to) two TensorCores and pick the largest batch
    tile whose double-buffered streams fit the VMEM budget."""
    n_par = 2 if batch % 16 == 0 else 1
    per_core = batch // n_par
    resident = d * c_pad * 2 + c_pad * 4 + 2 * c_pad * 4 + 8 * 128 * 4
    avail = max(vmem_limit - resident - (2 << 20), 1)

    def fits(tb):
        streamed = 2 * (tb * d * x_bytes + 2 * tb * c_pad * logit_bytes
                        + tb * 128 * 4)                # x, cls+kd, labels
        return streamed <= avail

    divisors = [t for t in range(per_core, 0, -1) if per_core % t == 0]
    for step in (256, 128, 8):                         # MXU / layout friendly first
        for t in divisors:
            if t % step == 0 and fits(t):
                return n_par, t
    if n_par == 2 and fits(per_core):
        return n_par, per_core
    return 1, batch                                    # full-dim block is always legal


def distillation_loss(inputs, outputs, outputs_kd, labels, w_teacher, b_teacher,
                      *, alpha=ALPHA, tau=TAU):
    """inputs [B,D], outputs/outputs_kd [B,C] (f32 or bf16 — passed through and
    upcast in-kernel), labels [B] int, Wt [D,C], bt [1,C]."""
    B, C = outputs.shape
    D = inputs.shape[1]

    # lane-pad the class dimension; pad lanes carry -1e30 so the kernel needs
    # no masking before the softmaxes (Wt pad columns stay 0 -> teacher pad
    # logit == bias pad == -1e30).
    c_pad = ((C + 127) // 128) * 128
    pad = c_pad - C
    if pad:
        outputs = jnp.pad(outputs, ((0, 0), (0, pad)), constant_values=_NEG)
        outputs_kd = jnp.pad(outputs_kd, ((0, 0), (0, pad)), constant_values=_NEG)
        b_teacher = jnp.pad(b_teacher, ((0, 0), (0, pad)), constant_values=_NEG)
        w_teacher = jnp.pad(w_teacher, ((0, 0), (0, pad)))

    labels2d = labels.astype(jnp.int32).reshape(B, 1)
    x_bf16 = inputs.astype(jnp.bfloat16)        # MXU operands in bf16
    w_bf16 = w_teacher.astype(jnp.bfloat16)     # cast once; resident across tiles
    bt_f32 = b_teacher.astype(jnp.float32)

    vmem_limit = _vmem_limit_bytes()
    wt_resident = D * c_pad * 2
    if wt_resident > vmem_limit // 2:
        # TODO(synk): tile the teacher head over a class-dim grid axis when the
        # resident weight block would blow the (v7x-sized) VMEM budget.
        raise NotImplementedError(
            f"resident teacher weight block ({wt_resident} B) exceeds half the "
            f"VMEM budget ({vmem_limit} B); class-dim tiling not implemented")

    n_par, tb = _plan_tiles(B, D, c_pad, x_bf16.dtype.itemsize,
                            outputs.dtype.itemsize, vmem_limit)
    inner = (B // n_par) // tb
    batch_idx = lambda p, j: (p * inner + j, 0)

    kernel = functools.partial(_distill_kernel, n_classes=C, c_pad=c_pad,
                               inv_tau=float(1.0 / tau), pad=pad)

    res = pl.pallas_call(
        kernel,
        out_shape=jax.ShapeDtypeStruct((n_par, 8, 128), jnp.float32),
        grid_spec=pltpu.PrefetchScalarGridSpec(
            num_scalar_prefetch=0,
            grid=(n_par, inner),
            in_specs=[
                pl.BlockSpec((tb, 1), batch_idx),        # labels (per tile)
                pl.BlockSpec((tb, D), batch_idx),        # teacher inputs
                _resident_spec((D, c_pad)),              # Wt, resident, 1-buffered
                _resident_spec((1, c_pad)),              # bt, resident, 1-buffered
                pl.BlockSpec((tb, c_pad), batch_idx),    # class-token logits
                pl.BlockSpec((tb, c_pad), batch_idx),    # dist-token logits
            ],
            out_specs=pl.BlockSpec((1, 8, 128), lambda p, j: (p, 0, 0)),
            scratch_shapes=[pltpu.VMEM((1, c_pad), jnp.float32),   # CE lane partials
                            pltpu.VMEM((1, c_pad), jnp.float32)],  # KL lane partials
        ),
        compiler_params=pltpu.CompilerParams(
            # batch split across TCs ("parallel"); per-core batch is a reduction
            dimension_semantics=("parallel", "arbitrary"),
            vmem_limit_bytes=vmem_limit,
        ),
        cost_estimate=pl.CostEstimate(
            flops=2 * B * D * c_pad + 20 * B * c_pad,
            transcendentals=3 * B * c_pad + 4 * B,   # 3 exp passes + per-row logs/recip
            bytes_accessed=(x_bf16.nbytes + w_bf16.nbytes + bt_f32.nbytes
                            + outputs.nbytes + outputs_kd.nbytes
                            + labels2d.nbytes + n_par * 8 * 128 * 4),
        ),
    )(labels2d, x_bf16, w_bf16, bt_f32, outputs, outputs_kd)

    # per-core raw partial sums -> normalize / T^2 / alpha blend (cheap in XLA)
    base_sum = jnp.sum(res[:, 0, 0])
    kl_sum = jnp.sum(res[:, 0, 1])
    base_part = (base_sum / B) * (1.0 - alpha)
    dist_part = (kl_sum * (tau * tau) / (B * C)) * alpha
    return base_part + dist_part, base_part, dist_part


if __name__ == "__main__":
    B, D, C = 32, 64, 48   # batch, teacher input features, num classes
    key = jax.random.PRNGKey(0)
    k1, k2, k3, k4, k5, k6 = jax.random.split(key, 6)

    inputs = jax.random.normal(k1, (B, D), jnp.float32)          # fed to teacher
    outputs = jax.random.normal(k2, (B, C), jnp.float32)         # class-token logits
    outputs_kd = jax.random.normal(k3, (B, C), jnp.float32)      # dist-token logits
    labels = jax.random.randint(k4, (B,), 0, C, dtype=jnp.int32)

    # deterministic synthetic teacher parameters
    w_teacher = jax.random.normal(k5, (D, C), jnp.float32) * 0.1
    b_teacher = jax.random.normal(k6, (1, C), jnp.float32) * 0.01

    loss, base_p, dist_p = distillation_loss(
        inputs, outputs, outputs_kd, labels, w_teacher, b_teacher)
    jax.block_until_ready((loss, base_p, dist_p))

    # pure-JAX reference (teacher matmul in bf16 to mirror the kernel's MXU path)
    t_logits = jnp.dot(inputs.astype(jnp.bfloat16), w_teacher.astype(jnp.bfloat16),
                       preferred_element_type=jnp.float32) + b_teacher
    log_p = jax.nn.log_softmax(outputs, axis=-1)
    base_ref = -jnp.mean(jnp.take_along_axis(log_p, labels[:, None], axis=-1))
    log_ps = jax.nn.log_softmax(outputs_kd / TAU, axis=-1)
    log_pt = jax.nn.log_softmax(t_logits / TAU, axis=-1)
    dist_ref = jnp.sum(jnp.exp(log_pt) * (log_pt - log_ps)) * (TAU * TAU) / (B * C)
    ref = (base_ref * (1 - ALPHA) + dist_ref * ALPHA,
           base_ref * (1 - ALPHA), dist_ref * ALPHA)

    assert all(bool(jnp.allclose(a, b, rtol=5e-2, atol=1e-4))
               for a, b in zip((loss, base_p, dist_p), ref)), \
        ((float(loss), float(base_p), float(dist_p)),
         tuple(float(r) for r in ref))
    print("KERNEL_OK")
</pallas_src>

<mosaic_0001>
module attributes {stable_mosaic.version = 11 : i64} {
  func.func @_distill_kernel(%arg0: i32, %arg1: i32, %arg2: memref<16x1xi32, #tpu.memory_space<vmem>>, %arg3: memref<16x64xbf16, #tpu.memory_space<vmem>>, %arg4: memref<64x128xbf16, #tpu.memory_space<vmem>>, %arg5: memref<1x128xf32, #tpu.memory_space<vmem>>, %arg6: memref<16x128xf32, #tpu.memory_space<vmem>>, %arg7: memref<16x128xf32, #tpu.memory_space<vmem>>, %arg8: memref<1x8x128xf32, #tpu.memory_space<vmem>>, %arg9: memref<1x128xf32, #tpu.memory_space<vmem>>, %arg10: memref<1x128xf32, #tpu.memory_space<vmem>>) attributes {dimension_semantics = [#tpu.dimension_semantics<parallel>, #tpu.dimension_semantics<arbitrary>], iteration_bounds = array<i64: 2, 1>, scalar_prefetch = 0 : i64, scratch_operands = 2 : i64, tpu.core_type = #tpu.core_type<tc>, window_params = [{transform_indices = @transform_0, window_bounds = array<i64: 16, 1>}, {transform_indices = @transform_1, window_bounds = array<i64: 16, 64>}, {pipeline_mode = #tpu.pipeline_mode<synchronous>, transform_indices = @transform_2, window_bounds = array<i64: 64, 128>}, {pipeline_mode = #tpu.pipeline_mode<synchronous>, transform_indices = @transform_3, window_bounds = array<i64: 1, 128>}, {transform_indices = @transform_4, window_bounds = array<i64: 16, 128>}, {transform_indices = @transform_5, window_bounds = array<i64: 16, 128>}, {transform_indices = @transform_6, window_bounds = array<i64: 1, 8, 128>}]} {
    %c0_i32 = arith.constant 0 : i32
    %0 = arith.cmpi eq, %arg1, %c0_i32 : i32
    %1 = arith.extui %0 : i1 to i32
    %c0_i32_0 = arith.constant 0 : i32
    %2 = arith.cmpi ne, %1, %c0_i32_0 : i32
    scf.if %2 {
      %cst_34 = arith.constant 0.000000e+00 : f32
      %76 = vector.broadcast %cst_34 : f32 to vector<1x128xf32>
      %c0_35 = arith.constant 0 : index
      %c0_36 = arith.constant 0 : index
      %77 = vector.load %arg9[%c0_35, %c0_36] : memref<1x128xf32, #tpu.memory_space<vmem>>, vector<1x128xf32>
      tpu.vector_store %arg9[%c0_35, %c0_36], %76 {strides = array<i32>} : memref<1x128xf32, #tpu.memory_space<vmem>>, vector<1x128xf32>,
      %cst_37 = arith.constant 0.000000e+00 : f32
      %78 = vector.broadcast %cst_37 : f32 to vector<1x128xf32>
      %c0_38 = arith.constant 0 : index
      %c0_39 = arith.constant 0 : index
      %79 = vector.load %arg10[%c0_38, %c0_39] : memref<1x128xf32, #tpu.memory_space<vmem>>, vector<1x128xf32>
      tpu.vector_store %arg10[%c0_38, %c0_39], %78 {strides = array<i32>} : memref<1x128xf32, #tpu.memory_space<vmem>>, vector<1x128xf32>,
    } else {
    }
    %3 = tpu.iota {dimensions = array<i32: 1>} : vector<16x128xi32>
    %c0 = arith.constant 0 : index
    %c0_1 = arith.constant 0 : index
    %4 = vector.load %arg3[%c0, %c0_1] : memref<16x64xbf16, #tpu.memory_space<vmem>>, vector<16x64xbf16>
    %c0_2 = arith.constant 0 : index
    %c0_3 = arith.constant 0 : index
    %5 = vector.load %arg4[%c0_2, %c0_3] : memref<64x128xbf16, #tpu.memory_space<vmem>>, vector<64x128xbf16>
    %cst = arith.constant dense<0.000000e+00> : vector<16x128xf32>
    %6 = tpu.matmul %4, %5, %cst {dimension_numbers = #tpu.dot_dimension_numbers<[1], [0], [0], [1], [0, 0, 1, 1], [], []>} : vector<16x64xbf16>, vector<64x128xbf16>, vector<16x128xf32> -> vector<16x128xf32>
    %c0_4 = arith.constant 0 : index
    %c0_5 = arith.constant 0 : index
    %7 = vector.load %arg5[%c0_4, %c0_5] : memref<1x128xf32, #tpu.memory_space<vmem>>, vector<1x128xf32>
    %8 = vector.broadcast %7 : vector<1x128xf32> to vector<16x128xf32>
    %9 = arith.addf %6, %8 : vector<16x128xf32>
    %c0_6 = arith.constant 0 : index
    %c0_7 = arith.constant 0 : index
    %10 = vector.load %arg6[%c0_6, %c0_7] : memref<16x128xf32, #tpu.memory_space<vmem>>, vector<16x128xf32>
    %cst_8 = arith.constant dense<0xFF800000> : vector<16xf32>
    %11 = vector.multi_reduction <maximumf>, %10, %cst_8 [1] : vector<16x128xf32> to vector<16xf32>
    %12 = vector.shape_cast %11 : vector<16xf32> to vector<16x1xf32>
    %13 = vector.broadcast %12 : vector<16x1xf32> to vector<16x128xf32>
    %14 = arith.subf %10, %13 : vector<16x128xf32>
    %15 = math.exp %14 : vector<16x128xf32>
    %cst_9 = arith.constant dense<0.000000e+00> : vector<16xf32>
    %16 = vector.multi_reduction <add>, %15, %cst_9 [1] : vector<16x128xf32> to vector<16xf32>
    %17 = vector.shape_cast %16 : vector<16xf32> to vector<16x1xf32>
    %18 = math.log %17 : vector<16x1xf32>
    %19 = vector.broadcast %18 : vector<16x1xf32> to vector<16x128xf32>
    %20 = arith.subf %14, %19 : vector<16x128xf32>
    %c0_10 = arith.constant 0 : index
    %c0_11 = arith.constant 0 : index
    %21 = vector.load %arg2[%c0_10, %c0_11] : memref<16x1xi32, #tpu.memory_space<vmem>>, vector<16x1xi32>
    %22 = vector.broadcast %21 : vector<16x1xi32> to vector<16x128xi32>
    %23 = arith.cmpi eq, %3, %22 : vector<16x128xi32>
    %24 = arith.extui %23 : vector<16x128xi1> to vector<16x128xi32>
    %25 = arith.sitofp %24 : vector<16x128xi32> to vector<16x128xf32>
    %c0_12 = arith.constant 0 : index
    %c0_13 = arith.constant 0 : index
    %26 = vector.load %arg9[%c0_12, %c0_13] : memref<1x128xf32, #tpu.memory_space<vmem>>, vector<1x128xf32>
    %cst_14 = arith.constant 0.000000e+00 : f32
    %27 = vector.broadcast %cst_14 : f32 to vector<16x128xf32>
    %28 = arith.subf %27, %20 : vector<16x128xf32>
    %29 = arith.mulf %25, %28 : vector<16x128xf32>
    %cst_15 = arith.constant dense<0.000000e+00> : vector<128xf32>
    %30 = vector.multi_reduction <add>, %29, %cst_15 [0] : vector<16x128xf32> to vector<128xf32>
    %31 = vector.shape_cast %30 : vector<128xf32> to vector<1x128xf32>
    %32 = arith.addf %26, %31 : vector<1x128xf32>
    %c0_16 = arith.constant 0 : index
    %c0_17 = arith.constant 0 : index
    %33 = vector.load %arg9[%c0_16, %c0_17] : memref<1x128xf32, #tpu.memory_space<vmem>>, vector<1x128xf32>
    tpu.vector_store %arg9[%c0_16, %c0_17], %32 {strides = array<i32>} : memref<1x128xf32, #tpu.memory_space<vmem>>, vector<1x128xf32>,
    %c0_18 = arith.constant 0 : index
    %c0_19 = arith.constant 0 : index
    %34 = vector.load %arg7[%c0_18, %c0_19] : memref<16x128xf32, #tpu.memory_space<vmem>>, vector<16x128xf32>
    %cst_20 = arith.constant 0.333333343 : f32
    %35 = vector.broadcast %cst_20 : f32 to vector<16x128xf32>
    %36 = arith.mulf %34, %35 : vector<16x128xf32>
    %cst_21 = arith.constant dense<0xFF800000> : vector<16xf32>
    %37 = vector.multi_reduction <maximumf>, %36, %cst_21 [1] : vector<16x128xf32> to vector<16xf32>
    %38 = vector.shape_cast %37 : vector<16xf32> to vector<16x1xf32>
    %39 = vector.broadcast %38 : vector<16x1xf32> to vector<16x128xf32>
    %40 = arith.subf %36, %39 : vector<16x128xf32>
    %41 = math.exp %40 : vector<16x128xf32>
    %cst_22 = arith.constant dense<0.000000e+00> : vector<16xf32>
    %42 = vector.multi_reduction <add>, %41, %cst_22 [1] : vector<16x128xf32> to vector<16xf32>
    %43 = vector.shape_cast %42 : vector<16xf32> to vector<16x1xf32>
    %44 = math.log %43 : vector<16x1xf32>
    %45 = vector.broadcast %44 : vector<16x1xf32> to vector<16x128xf32>
    %46 = arith.subf %40, %45 : vector<16x128xf32>
    %cst_23 = arith.constant 0.333333343 : f32
    %47 = vector.broadcast %cst_23 : f32 to vector<16x128xf32>
    %48 = arith.mulf %9, %47 : vector<16x128xf32>
    %cst_24 = arith.constant dense<0xFF800000> : vector<16xf32>
    %49 = vector.multi_reduction <maximumf>, %48, %cst_24 [1] : vector<16x128xf32> to vector<16xf32>
    %50 = vector.shape_cast %49 : vector<16xf32> to vector<16x1xf32>
    %51 = vector.broadcast %50 : vector<16x1xf32> to vector<16x128xf32>
    %52 = arith.subf %48, %51 : vector<16x128xf32>
    %53 = math.exp %52 : vector<16x128xf32>
    %cst_25 = arith.constant dense<0.000000e+00> : vector<16xf32>
    %54 = vector.multi_reduction <add>, %53, %cst_25 [1] : vector<16x128xf32> to vector<16xf32>
    %55 = vector.shape_cast %54 : vector<16xf32> to vector<16x1xf32>
    %56 = tpu.reciprocal %55 {approx = true} : vector<16x1xf32> -> vector<16x1xf32>
    %57 = vector.broadcast %56 : vector<16x1xf32> to vector<16x128xf32>
    %58 = arith.mulf %53, %57 : vector<16x128xf32>
    %59 = math.log %55 : vector<16x1xf32>
    %60 = vector.broadcast %59 : vector<16x1xf32> to vector<16x128xf32>
    %61 = arith.subf %52, %60 : vector<16x128xf32>
    %62 = arith.subf %61, %46 : vector<16x128xf32>
    %63 = arith.mulf %58, %62 : vector<16x128xf32>
    %c48_i32 = arith.constant 48 : i32
    %64 = vector.broadcast %c48_i32 : i32 to vector<16x128xi32>
    %65 = arith.cmpi slt, %3, %64 : vector<16x128xi32>
    %cst_26 = arith.constant 0.000000e+00 : f32
    %66 = vector.broadcast %cst_26 : f32 to vector<16x128xf32>
    %67 = arith.select %65, %63, %66 : vector<16x128xi1>, vector<16x128xf32>
    %c0_27 = arith.constant 0 : index
    %c0_28 = arith.constant 0 : index
    %68 = vector.load %arg10[%c0_27, %c0_28] : memref<1x128xf32, #tpu.memory_space<vmem>>, vector<1x128xf32>
    %cst_29 = arith.constant dense<0.000000e+00> : vector<128xf32>
    %69 = vector.multi_reduction <add>, %67, %cst_29 [0] : vector<16x128xf32> to vector<128xf32>
    %70 = vector.shape_cast %69 : vector<128xf32> to vector<1x128xf32>
    %71 = arith.addf %68, %70 : vector<1x128xf32>
    %c0_30 = arith.constant 0 : index
    %c0_31 = arith.constant 0 : index
    %72 = vector.load %arg10[%c0_30, %c0_31] : memref<1x128xf32, #tpu.memory_space<vmem>>, vector<1x128xf32>
    tpu.vector_store %arg10[%c0_30, %c0_31], %71 {strides = array<i32>} : memref<1x128xf32, #tpu.memory_space<vmem>>, vector<1x128xf32>,
    %c0_i32_32 = arith.constant 0 : i32
    %73 = arith.cmpi eq, %arg1, %c0_i32_32 : i32
    %74 = arith.extui %73 : i1 to i32
    %c0_i32_33 = arith.constant 0 : i32
    %75 = arith.cmpi ne, %74, %c0_i32_33 : i32
    scf.if %75 {
      %c0_34 = arith.constant 0 : index
      %c0_35 = arith.constant 0 : index
      %76 = vector.load %arg9[%c0_34, %c0_35] : memref<1x128xf32, #tpu.memory_space<vmem>>, vector<1x128xf32>
      %77 = vector.shape_cast %76 : vector<1x128xf32> to vector<1x1x128xf32>
      %cst_36 = arith.constant dense<0.000000e+00> : vector<1xf32>
      %78 = vector.multi_reduction <add>, %77, %cst_36 [1, 2] : vector<1x1x128xf32> to vector<1xf32>
      %79 = vector.shape_cast %78 : vector<1xf32> to vector<1x1x1xf32>
      %80 = vector.extract %79[0, 0, 0] : f32 from vector<1x1x1xf32>
      %c0_37 = arith.constant 0 : index
      %c0_38 = arith.constant 0 : index
      %81 = vector.load %arg10[%c0_37, %c0_38] : memref<1x128xf32, #tpu.memory_space<vmem>>, vector<1x128xf32>
      %82 = vector.shape_cast %81 : vector<1x128xf32> to vector<1x1x128xf32>
      %cst_39 = arith.constant dense<0.000000e+00> : vector<1xf32>
      %83 = vector.multi_reduction <add>, %82, %cst_39 [1, 2] : vector<1x1x128xf32> to vector<1xf32>
      %84 = vector.shape_cast %83 : vector<1xf32> to vector<1x1x1xf32>
      %85 = vector.extract %84[0, 0, 0] : f32 from vector<1x1x1xf32>
      %86 = tpu.iota {dimensions = array<i32: 2>} : vector<1x8x128xi32>
      %c0_i32_40 = arith.constant 0 : i32
      %87 = vector.broadcast %c0_i32_40 : i32 to vector<1x8x128xi32>
      %88 = arith.cmpi eq, %86, %87 : vector<1x8x128xi32>
      %c1_i32 = arith.constant 1 : i32
      %89 = vector.broadcast %c1_i32 : i32 to vector<1x8x128xi32>
      %90 = arith.cmpi eq, %86, %89 : vector<1x8x128xi32>
      %cst_41 = arith.constant 0.000000e+00 : f32
      %91 = vector.broadcast %85 : f32 to vector<1x8x128xf32>
      %92 = vector.broadcast %cst_41 : f32 to vector<1x8x128xf32>
      %93 = arith.select %90, %91, %92 : vector<1x8x128xi1>, vector<1x8x128xf32>
      %94 = vector.broadcast %80 : f32 to vector<1x8x128xf32>
      %95 = arith.select %88, %94, %93 : vector<1x8x128xi1>, vector<1x8x128xf32>
      %c0_42 = arith.constant 0 : index
      %c0_43 = arith.constant 0 : index
      %c0_44 = arith.constant 0 : index
      %96 = vector.load %arg8[%c0_42, %c0_43, %c0_44] : memref<1x8x128xf32, #tpu.memory_space<vmem>>, vector<1x8x128xf32>
      tpu.vector_store %arg8[%c0_42, %c0_43, %c0_44], %95 {strides = array<i32>} : memref<1x8x128xf32, #tpu.memory_space<vmem>>, vector<1x8x128xf32>,
    } else {
    }
    return
  }
  func.func @transform_0(%arg0: i32, %arg1: i32) -> (i32, i32) {
    %c1_i32 = arith.constant 1 : i32
    %0 = arith.muli %arg0, %c1_i32 : i32
    %1 = arith.addi %0, %arg1 : i32
    %c0_i32 = arith.constant 0 : i32
    %c0_i32_0 = arith.constant 0 : i32
    return %1, %c0_i32 : i32, i32
  }
  func.func @transform_1(%arg0: i32, %arg1: i32) -> (i32, i32) {
    %c1_i32 = arith.constant 1 : i32
    %0 = arith.muli %arg0, %c1_i32 : i32
    %1 = arith.addi %0, %arg1 : i32
    %c0_i32 = arith.constant 0 : i32
    %c0_i32_0 = arith.constant 0 : i32
    return %1, %c0_i32 : i32, i32
  }
  func.func @transform_2(%arg0: i32, %arg1: i32) -> (i32, i32) {
    %c0_i32 = arith.constant 0 : i32
    %c0_i32_0 = arith.constant 0 : i32
    %c0_i32_1 = arith.constant 0 : i32
    return %c0_i32, %c0_i32_0 : i32, i32
  }
  func.func @transform_3(%arg0: i32, %arg1: i32) -> (i32, i32) {
    %c0_i32 = arith.constant 0 : i32
    %c0_i32_0 = arith.constant 0 : i32
    %c0_i32_1 = arith.constant 0 : i32
    return %c0_i32, %c0_i32_0 : i32, i32
  }
  func.func @transform_4(%arg0: i32, %arg1: i32) -> (i32, i32) {
    %c1_i32 = arith.constant 1 : i32
    %0 = arith.muli %arg0, %c1_i32 : i32
    %1 = arith.addi %0, %arg1 : i32
    %c0_i32 = arith.constant 0 : i32
    %c0_i32_0 = arith.constant 0 : i32
    return %1, %c0_i32 : i32, i32
  }
  func.func @transform_5(%arg0: i32, %arg1: i32) -> (i32, i32) {
    %c1_i32 = arith.constant 1 : i32
    %0 = arith.muli %arg0, %c1_i32 : i32
    %1 = arith.addi %0, %arg1 : i32
    %c0_i32 = arith.constant 0 : i32
    %c0_i32_0 = arith.constant 0 : i32
    return %1, %c0_i32 : i32, i32
  }
  func.func @transform_6(%arg0: i32, %arg1: i32) -> (i32, i32, i32) {
    %c0_i32 = arith.constant 0 : i32
    %c0_i32_0 = arith.constant 0 : i32
    %c0_i32_1 = arith.constant 0 : i32
    return %arg0, %c0_i32, %c0_i32_0 : i32, i32, i32
  }
}

</mosaic_0001>

<bundles_post_ra>
// kernel: tpu_custom_call.1
= control target key start
LH: loop header
LB: loop body
LE: loop exit
PB: predicated region body
PF: predicated region fallthrough
CT: control target
= control target key end

     0   :  { %s1377_s0 = inlined_call_operand.vmem [shape: s32[32,1], index: 0, kind: input, shape index: {}]   ;;  %s1378_s1 = inlined_call_operand.hbm [shape: bf16[32,64], index: 1, kind: input, shape index: {}]   ;;  %s1379_s2 = inlined_call_operand.vmem [shape: bf16[64,128], index: 2, kind: input, shape index: {}]   ;;  %s1380_s3 = inlined_call_operand.vmem [shape: f32[1,128], index: 3, kind: input, shape index: {}]   ;;  %s1381_s4 = inlined_call_operand.hbm [shape: f32[32,128], index: 4, kind: input, shape index: {}]   ;;  %s1382_s5 = inlined_call_operand.hbm [shape: f32[32,128], index: 5, kind: input, shape index: {}]   ;;  %s1383_s6 = inlined_call_operand.hbm [shape: f32[2,8,128], index: 6, kind: output, shape index: {}]  }
   0x1   :  { %1389 = sst [smem:[#allocation20_spill]] %s1381_s4 }
   0x2   :  { %1390 = sst [smem:[#allocation21_spill]] %s1382_s5 }
   0x3   :  { %11 = vsyncpa [#allocation5], 0 }
   0x4   :  { %13 = vsyncpa [#allocation5 + $0x1], 0 }
   0x5   :  { %14 = vsyncpa [#allocation8], 0 }
   0x6   :  { %16 = vsyncpa [#allocation8 + $0x1], 0 }
   0x7   :  { %17 = vsyncpa [#allocation6], 0 }
   0x8   :  { %19 = vsyncpa [#allocation6 + $0x1], 0  ;;  %s1168_s21 = smov 0   ;;  %s1170_s22 = smov 0  }
   0x9   :  { %s1172_s23 = smov 0   ;;  %s1174_s24 = smov 0  }
   0xa   :  { %s1176_s25 = smov 0   ;;  %s1178_s26 = smov 0  }
   0xb LB: > { %1391 = sst [smem:[#allocation14_spill]] %s1105_s21  ;;  %s1199_s27 = sadd.s32 4294967295, %s1125_s26   ;;  %s1125_s26 = sphi %s1178_s26, %s25_s26   ;;  %s1121_s25 = sphi %s1176_s25, %s1410_s25   ;;  %s1117_s24 = sphi %s1174_s24, %s1409_s24   ;;  %s1113_s23 = sphi %s1172_s23, %s1408_s23   ;;  %s1109_s22 = sphi %s1170_s22, %s1412_s22   ;;  %s1105_s21 = sphi %s1168_s21, %s1411_s21  }
   0xc   : > { %1392 = sst [smem:[#allocation15_spill]] %s1113_s23  ;;  %s782_s28 = sadd.s32 4294967294, %s1125_s26  }
   0xd   : > { %1393 = sst [smem:[#allocation16_spill]] %s1121_s25  ;;  %s37_s29 = sadd.s32 1, %s1121_s25 }
   0xe   : > { %s74_s30 = sadd.s32 1, %s1113_s23  ;;  %p39_p0 = scmp.ge.s32.totalorder %s37_s29, 2 }
   0xf   : > { %p81_p1 = scmp.ne.s32.totalorder %s1113_s23, %s1109_s22  ;;  %p82_p2 = scmp.eq.s32.totalorder %s1125_s26, 0 }
  0x10   : > { %p87_p3 = scmp.ne.s32.totalorder %s1109_s22, %s1105_s21  ;;  %s1414_s29 = smov (%p39_p0, %s37_s29), 0 }
  0x11   : > { %1394 = sst [smem:[#allocation17_spill]] %s1414_s29  ;;  %p1211_p4 = por %p82_p2, %p81_p1 }
  0x12   : > { %p88_p5 = scmp.eq.s32.totalorder %s1199_s27, 0  ;;  %s71_s8 = ssub.s32 %s1121_s25, %s1414_s29 }
  0x13   : > { %p209_p6 = scmp.eq.s32.totalorder %s1199_s27, 1  ;;  %p72_p7 = scmp.eq.s32.totalorder %s71_s8, 0 }
  0x14   : > { %p1219_p8 = por %p88_p5, %p87_p3  ;;  %p215_p10 = scmp.eq.s32.totalorder %s782_s28, 1 }
  0x15   : > { %p1223_p9 = por %p209_p6, %p81_p1  ;;  %p784_p12 = scmp.ge.s32.totalorder %s1125_s26, 2 }
  0x16   : > { %s1228_s11 = scalar_select %p72_p7, %s1113_s23, %s74_s30  }
  0x17   : > { %p1230_p11 = por %p215_p10, %p87_p3  ;;  %p862_p13 = scmp.lt.s32.totalorder %s1125_s26, 2 }
  0x18   : > { %1398 = sst [smem:[#allocation18_spill]] %s1228_s11  ;;  %s1237_s13 = sand.u32 1, %s1113_s23  }
  0x19   : > { %s1399_s12 = scalar_select %p1230_p11, 1, 0 }
  0x1a   : > { %s275_s14 = sand.u32 1, %s1125_s26   ;;  %s788_s15 = sshll.u32 %s1237_s13, 4 }
  0x1b   : > { %1400 = sst [smem:[#allocation19_spill]] %s1399_s12  ;;  %p1243_p0 = pnand %p862_p13, %p1211_p4 }
  0x1c   : > { %s829_s17 = sshll.u32 %s1121_s25, 4  ;;  %s1402_s4 = sld [smem:[#allocation20_spill]] }
  0x1d   : > { %s279_s30 = scalar_lea.vmem [#allocation7], %s788_s15  ;;  %s1251_s7 = scalar_lea.sflag [#allocation8], %s275_s14 }
  0x1e   : > { %s288_s8 = sshll.u32 %s279_s30, 4  ;;  %s1127_s29 = smov 128   ;;  %s289_s8 = int_to_ptr.vmem [resolvable:$true] %s288_s8 }
  0x1f   : > { %s1128_s11 = smov 8   ;;  %s1403_s5 = sld [smem:[#allocation21_spill]] }
  0x20   : > { %p794_p1 = scmp.ge.s32.totalorder %s1125_s26, 1  ;;  %p319_p2 = scmp.lt.s32.totalorder %s1125_s26, 3 }
  0x21   : > { %s828_s30 = sshll.u32 %s1121_s25, 3  ;;  %s1130_s21 = smov 4  }
  0x22   : > { %s285_s20 = scalar_lea.hbm %s1402_s4, %s829_s17  ;;  %p1261_p3 = pnand %p794_p1, %p319_p2 }
  0x23   : > { %s286_s28 = sshll.u32 %s285_s20, 4  ;;  %s302_s20 = scalar_lea.vmem [#allocation9], %s788_s15  ;;  %s287_s28 = int_to_ptr.hbm [resolvable:$true] %s286_s28 }
  0x24   : > { %854 = dma.hbm_to_vmem [thread:$0]  (!%p1243_p0), %s287_s28, 256, %s289_s8, %s1251_s7, %s1127_s29, %s1127_s29, %s1128_s11  }
  0x25   : > { %s308_s18 = scalar_lea.hbm %s1403_s5, %s829_s17  ;;  %s311_s4 = sshll.u32 %s302_s20, 4  ;;  %s312_s4 = int_to_ptr.vmem [resolvable:$true] %s311_s4 }
  0x26   : > { %s309_s19 = sshll.u32 %s308_s18, 4  ;;  %s785_s28 = sshll.u32 %s1237_s13, 3  ;;  %s310_s19 = int_to_ptr.hbm [resolvable:$true] %s309_s19 }
  0x27   : > { %s262_s12 = scalar_lea.hbm %s1378_s1, %s828_s30  ;;  %s256_s15 = scalar_lea.vmem [#allocation4], %s785_s28 }
  0x28   : > { %s263_s17 = sshll.u32 %s262_s12, 4  ;;  %s265_s18 = sshll.u32 %s256_s15, 4  ;;  %s264_s17 = int_to_ptr.hbm [resolvable:$true] %s263_s17  ;;  %s266_s18 = int_to_ptr.vmem [resolvable:$true] %s265_s18 }
  0x29   : > { %s253_s20 = scalar_lea.sflag [#allocation5], %s1237_s13  ;;  %s1129_s5 = smov 64  }
  0x2a   : > { %851 = dma.hbm_to_vmem [thread:$0]  (!%p1243_p0), %s264_s17, 128, %s266_s18, %s253_s20, %s1129_s5, %s1129_s5, %s1130_s21  }
  0x2b   : > { %857 = dma.hbm_to_vmem [thread:$0]  (!%p1243_p0), %s310_s19, 256, %s312_s4, %s1251_s7, %s1127_s29, %s1127_s29, %s1128_s11  }
  0x2c   : > { %323 = sbr.rel (%p1261_p3) target bundleno = 690 (0x2b2), region = 44  ;;  %s1279_s25 = sand.u32 (!%p1261_p3), 1, %s1109_s22  }
  0x2d   : > { %s795_s28 = sshll.u32 (!%p1261_p3), %s1279_s25, 3  ;;  %s326_s30 = scalar_lea.sflag (!%p1261_p3), [#allocation5], %s1279_s25 }
  0x2e   : > { %s329_s13 = scalar_lea.vmem (!%p1261_p3), [#allocation4], %s795_s28 }
  0x31   : > { %1092 = dma.done.wait (%p1219_p8), %s326_s30, 128  }
  0x32   : > { %1094 = vsyncadd (%p1219_p8), %s326_s30, 4294967168  ;;  %s335_s4 = sand.u32 1, %s1199_s27   ;;  %s796_s5 = sshll.u32 %s1279_s25, 4 }
  0x33   : > { %s336_s21 = scalar_lea.sflag [#allocation8], %s335_s4  ;;  %s339_s29 = scalar_lea.vmem [#allocation7], %s796_s5 }
  0x34   : > { %1096 = dma.done.wait (%p1219_p8), %s336_s21, 512  }
  0x35   : > { %1098 = vsyncadd (%p1219_p8), %s336_s21, 4294966784  ;;  %s349_s11 = scalar_lea.vmem [#allocation9], %s796_s5  ;;  %v835_v1 = vld [vmem:[%s1379_s2 + $0x18] sm:$0xff]  ;;  %v834_v3 = vld [vmem:[%s1379_s2 + $0x10] sm:$0xff]  ;;  %vm461_vm0 = vcmask 523264   ;;  %s799_s15 = sshll.u32 %s1117_s24, 1  ;;  %v416_v60 = vlaneseq }
  0x36   : > { %v529_v0 = vld [vmem:[%s349_s11] sm:$0xff]  ;;  %469 = vmatpush.bf16.msra.mxu0 %v835_v1  ;;  %v530_v5 = vld [vmem:[%s349_s11 + $0x8] sm:$0xff]  ;;  %p397_p4 = scmp.lt.s32.totalorder %s799_s15, 3  ;;  %v1131_v30 = vmov 0   ;;  %v1132_v45 = vmov 0.0   ;;  %vm600_vm4 = vcmask 1040384  }
  0x37   : > { %v531_v2 = vmul.f32 0.33333334, %v529_v0  ;;  %v479_v4 = vld [vmem:[%s339_s29] sm:$0xff]  ;;  %v532_v7 = vmul.f32 0.33333334, %v530_v5  ;;  %v831_v9 = vld [vmem:[%s329_s13] sm:$0xff]  ;;  %919 = vset.pattern.permute.xlu1 %v1131_v30  ;;  %918 = vset.pattern.permute.xlu0 %v1131_v30 }
  0x38   : > { %481 = vmax.xlane.f32.xlu2 %v479_v4  ;;  %v833_v6 = vld [vmem:[%s1379_s2 + $0x8] sm:$0xff]  ;;  %v832_v8 = vld [vmem:[%s1379_s2] sm:$0xff]  ;;  %s1416_s15 = smov (!%p397_p4, %s799_s15), 3  ;;  %414 = vst [vmem:[#allocation2] sm:$0x1] %v1132_v45  ;;  %v1327_v5 = vand.u32 127, %v416_v60 }
  0x39   : > { %533 = vmax.xlane.f32.xlu0 %v531_v2  ;;  %v480_v13 = vld [vmem:[%s339_s29 + $0x8] sm:$0xff]  ;;  %s800_s18 = sshll.u32 %s1416_s15, 3  ;;  %415 = vst [vmem:[#allocation3] sm:$0x1] %v1132_v45  ;;  %s825_s4 = sshll.u32 %s1117_s24, 3 }
  0x3a   : > { %470 = vmatpush.bf16.msra.mxu0 %v834_v3  ;;  %v920_v15 = vld [vmem:[%s1380_s3] ss:$0 sm:$0xff]  ;;  %s400_s13 = scalar_lea.vmem %s1377_s0, %s800_s18  ;;  %vm583_vm1 = vcmp.lt.s32.totalorder %v1327_v5, 48  ;;  %s640_s29 = scalar_lea.hbm %s1383_s6, %s825_s4  ;;  %vm623_vm5 = vcmp.eq.s32.totalorder %v1327_v5, 1  ;;  %vm622_vm6 = vcmp.eq.s32.totalorder %v1327_v5, 0 }
  0x3b   : > { %v502_v31 = vld [vmem:[%s400_s13 + $0x8] sm:$0xff]  ;;  %v501_v44 = vld [vmem:[%s400_s13] sm:$0xff]  ;;  %s394_s11 = scalar_lea.vmem [#allocation10], %s795_s28  ;;  %s644_s19 = sshll.u32 %s640_s29, 4  ;;  %s645_s19 = int_to_ptr.hbm [resolvable:$true] %s644_s19 }
  0x3c   : > { %s642_s16 = sshll.u32 %s394_s11, 4  ;;  %s630_s24 = scalar_lea.sflag [#allocation6], %s1279_s25  ;;  %s643_s16 = int_to_ptr.vmem [resolvable:$true] %s642_s16 }
  0x3d   : > { %s1053_s27 = sshra.s32 %s645_s19, 4  ;;  %s1059_s23 = scalar_lea.hbm %s1383_s6, 16  ;;  %s1054_s27 = int_to_ptr.hbm [resolvable:$true] %s1053_s27 }
  0x3e   : > { %471 = vmatpush.bf16.msra.mxu0 %v833_v6  ;;  %s1055_s28 = scalar_lea.hbm %s1054_s27, 8  ;;  %p1060_p8 = scmp.lt.s32.totalorder %s1054_s27, %s1383_s6 }
  0x3f   : > { %p1056_p5 = scmp.ne.s32.totalorder %s1054_s27, %s1055_s28  ;;  %p1061_p10 = scmp.lt.s32.totalorder %s1059_s23, %s1055_s28 }
  0x40   : > { %483 = vmax.xlane.f32.xlu2 %v480_v13 }
  0x41   : > { %535 = vmax.xlane.f32.xlu0 %v532_v7  ;;  %p1057_p6 = pnand %p1056_p5, %p1223_p9  ;;  %p1062_p13 = por %p1061_p10, %p1060_p8 }
  0x42   : > { %472 = vmatpush.bf16.msra.mxu0 %v832_v8 }
  0x43   : > { %p1058_p7 = pneg %p1057_p6 }
  0x45   : > { %821 = vmatmul.msk.bf16.vlgmr.msra.gmra.mxu0 %vm461_vm0, %v831_v9  ;;  %p1063_p0 = pnand %p1062_p13, %p1058_p7 }
  0xab   : > { %v482_v24 = vpop.xlane.xlu2 %481 }
  0xac   : > { %v534_v10 = vpop.xlane.xlu0 %533  ;;  %v1316_v26 = vsub.f32 %v479_v4, %v482_v24 }
  0xad   : > { %v1307_v11 = vsub.f32 %v531_v2, %v534_v10 }
  0xae   : > { %v487_v27 = vmul.f32 1.442695, %v1316_v26 }
  0xaf   : > { %v539_v12 = vmul.f32 1.442695, %v1307_v11 }
  0xb1   : > { %921 = vpow2.f32 %v539_v12 }
  0xb3   : > { %v484_v33 = vpop.xlane.xlu2 %483 }
  0xb4   : > { %v536_v18 = vpop.xlane.xlu0 %535  ;;  %v1323_v36 = vsub.f32 %v480_v13, %v484_v33 }
  0xb5   : > { %v1313_v20 = vsub.f32 %v532_v7, %v536_v18 }
  0xb6   : > { %v489_v37 = vmul.f32 1.442695, %v1323_v36 }
  0xb7   : > { %v922_v14 = vpop.eup %921  ;;  %v541_v22 = vmul.f32 1.442695, %v1313_v20 }
  0xb8   : > { %543 = vadd.xlane.f32.xlu0 %v922_v14 }
  0xb9   : > { %923 = vpow2.f32 %v541_v22 }
  0xba   : > { %925 = vpow2.f32 %v487_v27 }
  0xbf   : > { %v924_v28 = vpop.eup %923 }
  0xc0   : > { %v926_v29 = vpop.eup %925 }
  0xc2   : > { %v474_v16 = vpop.f32.mrf.mxu0 }
  0xc3   : > { %v475_v17 = vadd.f32 %v920_v15, %v474_v16 }
  0xc5   : > { %v553_v19 = vmul.f32 0.33333334, %v475_v17 }
  0xc7   : > { %555 = vmax.xlane.f32.xlu1 %v553_v19 }
  0xca   : > { %v476_v21 = vpop.f32.mrf.mxu0 }
  0xcb   : > { %v477_v23 = vadd.f32 %v920_v15, %v476_v21 }
  0xcd   : > { %v554_v25 = vmul.f32 0.33333334, %v477_v23 }
  0xcf   : > { %557 = vmax.xlane.f32.xlu1 %v554_v25 }
  0xd7   : > { %545 = vadd.xlane.f32.xlu1 %v924_v28 }
  0xdf   : > { %491 = vadd.xlane.f32.xlu1 %v926_v29 }
  0xf8   : > { %507 = vperm.xlu1 %919, %v502_v31  }
 0x12b   : > { %v544_v47 = vpop.xlane.xlu0 %543 }
 0x13a   : > { %v556_v32 = vpop.xlane.xlu1 %555 }
 0x13b   : > { %v559_v34 = vsub.f32 %v553_v19, %v556_v32 }
 0x13d   : > { %v561_v35 = vmul.f32 1.442695, %v559_v34 }
 0x13f   : > { %927 = vpow2.f32 %v561_v35  ;;  %v586_v35 = vld [vmem:[#allocation3] sm:$0x1] }
 0x140   : > { %929 = vpow2.f32 %v489_v37 }
 0x142   : > { %v558_v38 = vpop.xlane.xlu1 %557 }
 0x143   : > { %v560_v39 = vsub.f32 %v554_v25, %v558_v38 }
 0x145   : > { %v928_v40 = vpop.eup %927  ;;  %v563_v41 = vmul.f32 1.442695, %v560_v39 }
 0x146   : > { %565 = vadd.xlane.f32.xlu2 %v928_v40  ;;  %v930_v42 = vpop.eup %929 }
 0x147   : > { %931 = vpow2.f32 %v563_v41  ;;  %v515_v41 = vld [vmem:[#allocation2] sm:$0x1] }
 0x14a   : > { %v546_v46 = vpop.xlane.xlu1 %545 }
 0x14d   : > { %v932_v43 = vpop.eup %931 }
 0x14e   : > { %493 = vadd.xlane.f32.xlu2 %v930_v42  ;;  %567 = vadd.xlane.f32.xlu0 %v932_v43 }
 0x152   : > { %v492_v49 = vpop.xlane.xlu1 %491 }
 0x162   : > { %504 = vperm.xlu0 %918, %v501_v44  }
 0x16a   : > { %v508_v10 = vpop.permute.xlu1 %507 }
 0x16b   : > { %vm510_vm2 = vcmp.eq.s32.totalorder %v1327_v5, %v508_v10 }
 0x16c   : > { %v823_v21 = vsel %vm510_vm2, 1.0, %v1132_v45 }
 0x1b9   : > { %v566_v48 = vpop.xlane.xlu2 %565 }
 0x1ba   : > { %933 = vlog2.f32 %v566_v48 }
 0x1bb   : > { %935 = vlog2.f32 %v544_v47 }
 0x1bc   : > { %937 = vlog2.f32 %v546_v46 }
 0x1bd   : > { %939 = vlog2.f32 %v492_v49 }
 0x1c0   : > { %v934_v50 = vpop.eup %933 }
 0x1c1   : > { %v494_v51 = vpop.xlane.xlu2 %493  ;;  %v568_v52 = vpop.xlane.xlu0 %567  ;;  %v574_v54 = vmul.f32 0.6931472, %v934_v50 }
 0x1c2   : > { %v936_v53 = vpop.eup %935  ;;  %941 = vlog2.f32 %v494_v51 }
 0x1c3   : > { %943 = vrcp.f32 %v566_v48  ;;  %v548_v55 = vmul.f32 0.6931472, %v936_v53  ;;  %v938_v56 = vpop.eup %937  ;;  %v577_v58 = vsub.f32 %v559_v34, %v574_v54 }
 0x1c4   : > { %945 = vlog2.f32 %v568_v52  ;;  %v940_v57 = vpop.eup %939  ;;  %v550_v63 = vmul.f32 0.6931472, %v938_v56 }
 0x1c5   : > { %947 = vrcp.f32 %v568_v52  ;;  %v551_v62 = vsub.f32 %v1307_v11, %v548_v55  ;;  %v496_v7 = vmul.f32 0.6931472, %v940_v57 }
 0x1c6   : > { %v552_v6 = vsub.f32 %v1313_v20, %v550_v63 }
 0x1c7   : > { %v579_v1 = vsub.f32 %v577_v58, %v551_v62  ;;  %v499_v11 = vsub.f32 %v1316_v26, %v496_v7 }
 0x1c8   : > { %v942_v59 = vpop.eup %941 }
 0x1c9   : > { %v944_v61 = vpop.eup %943  ;;  %v498_v2 = vmul.f32 0.6931472, %v942_v59  ;;  %v516_v23 = vsub.f32 0.0, %v499_v11 }
 0x1ca   : > { %v946_v0 = vpop.eup %945  ;;  %v571_v8 = vmul.f32 %v944_v61, %v928_v40 }
 0x1cb   : > { %v576_v3 = vmul.f32 0.6931472, %v946_v0  ;;  %v948_v4 = vpop.eup %947  ;;  %v500_v13 = vsub.f32 %v1323_v36, %v498_v2 }
 0x1cc   : > { %v581_v12 = vmul.f32 %v579_v1, %v571_v8  ;;  %v572_v14 = vmul.f32 %v948_v4, %v932_v43 }
 0x1cd   : > { %v578_v9 = vsub.f32 %v560_v39, %v576_v3  ;;  %v517_v19 = vsub.f32 0.0, %v500_v13 }
 0x1ce   : > { %v584_v17 = vsel %vm583_vm1, %v581_v12, 0.0 }
 0x1cf   : > { %v580_v15 = vsub.f32 %v578_v9, %v552_v6  ;;  %v519_v27 = vmul.f32 %v823_v21, %v517_v19 }
 0x1d1   : > { %v582_v16 = vmul.f32 %v580_v15, %v572_v14 }
 0x1d3   : > { %v585_v18 = vsel %vm583_vm1, %v582_v16, 0.0 }
 0x1d4   : > { %v587_v20 = vadd.f32 %v585_v18, %v584_v17  ;;  %v505_v22 = vpop.permute.xlu0 %504 }
 0x1d5   : > { %vm509_vm3 = vcmp.eq.s32.totalorder %v1327_v5, %v505_v22 }
 0x1d6   : > { %v588_v24 = vrot.slane %v587_v20, 4  ;;  %v822_v25 = vsel %vm509_vm3, 1.0, %v1132_v45 }
 0x1d7   : > { %v518_v28 = vmul.f32 %v822_v25, %v516_v23 }
 0x1d8   : > { %v589_v29 = vadd.f32 %v588_v24, %v587_v20 }
 0x1d9   : > { %v520_v30 = vadd.f32 %v519_v27, %v518_v28 }
 0x1da   : > { %v590_v31 = vrot.slane %v589_v29, 2 }
 0x1db   : > { %v521_v26 = vrot.slane %v520_v30, 4 }
 0x1dc   : > { %v591_v32 = vadd.f32 %v590_v31, %v589_v29 }
 0x1dd   : > { %v522_v33 = vadd.f32 %v521_v26, %v520_v30 }
 0x1de   : > { %v592_v34 = vrot.slane %v591_v32, 1 }
 0x1df   : > { %v523_v36 = vrot.slane %v522_v33, 2 }
 0x1e0   : > { %v593_v37 = vadd.f32 %v592_v34, %v591_v32 }
 0x1e1   : > { %v524_v38 = vadd.f32 %v523_v36, %v522_v33 }
 0x1e2   : > { %v594_v39 = vadd.f32 %v593_v37, %v586_v35 }
 0x1e3   : > { %v525_v40 = vrot.slane %v524_v38, 1 }
 0x1e4   : > { %595 = vst [vmem:[#allocation3] sm:$0x1] %v594_v39 }
 0x1e5   : > { %v526_v42 = vadd.f32 %v525_v40, %v524_v38 }
 0x1e7   : > { %v527_v43 = vadd.f32 %v526_v42, %v515_v41 }
 0x1e9   : > { %528 = vst [vmem:[#allocation2] sm:$0x1] %v527_v43 }
 0x1eb   : > { %v611_v46 = vld [vmem:[#allocation3] sm:$0x1] }
 0x1ec   : > { %v612_v47 = vsel %vm600_vm4, %v611_v46, 0.0 }
 0x1f0   : > { %v599_v44 = vld [vmem:[#allocation2] sm:$0x1] }
 0x1f1   : > { %v601_v45 = vsel %vm600_vm4, %v599_v44, 0.0 }
 0x1f2   : > { %602 = vadd.xlane.f32.xlu2 %v601_v45 }
 0x1fa   : > { %613 = vadd.xlane.f32.xlu2 %v612_v47 }
 0x265   : > { %v603_v48 = vpop.xlane.xlu2 %602 }
 0x266   : > { %v604_v49 = vrot.slane %v603_v48, 4 }
 0x268   : > { %v605_v50 = vadd.f32 %v604_v49, %v603_v48 }
 0x26a   : > { %v606_v51 = vrot.slane %v605_v50, 2 }
 0x26c   : > { %v607_v52 = vadd.f32 %v606_v51, %v605_v50 }
 0x26d   : > { %v614_v53 = vpop.xlane.xlu2 %613 }
 0x26e   : > { %v615_v54 = vrot.slane %v614_v53, 4  ;;  %v608_v55 = vrot.slane %v607_v52, 1 }
 0x270   : > { %v616_v56 = vadd.f32 %v615_v54, %v614_v53  ;;  %v609_v57 = vadd.f32 %v608_v55, %v607_v52 }
 0x272   : > { %v617_v58 = vrot.slane %v616_v56, 2  ;;  %836 = vpush %v609_v57 }
 0x274   : > { %v618_v59 = vadd.f32 %v617_v58, %v616_v56 }
 0x276   : > { %v619_v60 = vrot.slane %v618_v59, 1 }
 0x278   : > { %v620_v61 = vadd.f32 %v619_v60, %v618_v59 }
 0x27a   : > { %838 = vpush %v620_v61 }
 0x2a3   : > { %s837_s7 = spop %836 }
 0x2a4   : > { %v626_v63 = vstv %s837_s7 }
 0x2ab   : > { %s839_s14 = spop %838 }
 0x2ac   : > { %v624_v62 = vstv %s839_s14 }
 0x2ad   : > { %v625_v0 = vsel %vm623_vm5, %v624_v62, 0.0 }
 0x2ae   : > { %v627_v1 = vsel %vm622_vm6, %v626_v63, %v625_v0 }
 0x2af   : > { %628 = vst [vmem:[%s394_s11] sm:$0xff] %v627_v1 }
 0x2b0   : > { %1066 = shalt.err (!%p1063_p0)
}
 0x2b1   : > { %846 = dma.vmem_to_hbm [thread:$0]  (%p1223_p9), %s643_s16, 128, %s645_s19, %s630_s24  }
 0x2b2 PF: > { %s1405_s25 = sld [smem:[#allocation14_spill]]  ;;  %p859_p1 = pnand %p784_p12, %p1230_p11 }
 0x2b4   : > { %p860_p2 = pneg %p859_p1 }
 0x2b8   : > { %s656_s18 = sand.u32 1, %s1405_s25  }
 0x2b9   : > { %s657_s20 = scalar_lea.sflag [#allocation6], %s656_s18 }
 0x2ba   : > { %1100 = dma.done.wait (%p860_p2), %s657_s20, 128  }
 0x2bb   : > { %1102 = vsyncadd (%p860_p2), %s657_s20, 4294967168  ;;  %s25_s26 = sadd.s32 1, %s1125_s26   ;;  %s1407_s30 = sld [smem:[#allocation15_spill]] }
 0x2bc   : > { %p22_p3 = scmp.ge.s32.totalorder %s25_s26, 4   ;;  %s1408_s23 = sld [smem:[#allocation18_spill]] }
 0x2bd   : > { %s1409_s24 = sld [smem:[#allocation16_spill]]  ;;  %s1411_s21 = smov %s1109_s22 }
 0x2be   : > { %s1410_s25 = sld [smem:[#allocation17_spill]]  ;;  %24 = sbr.rel (!%p22_p3) target bundleno = 11 (0xb), region = 124 }
 0x2c1   : > { %s1412_s22 = smov %s1407_s30 }
 0x2c3   :  { %663 = vsyncpa [#allocation5], 1 }
 0x2c4   :  { %665 = vsyncpa [#allocation5 + $0x1], 1 }
 0x2c5   :  { %666 = vsyncpa [#allocation8], 1 }
 0x2c6   :  { %668 = vsyncpa [#allocation8 + $0x1], 1 }
 0x2c7   :  { %669 = vsyncpa [#allocation6], 1 }
 0x2c8   :  { %671 = vsyncpa [#allocation6 + $0x1], 1 }

</bundles_post_ra>
